<compile_context>
chip_gen: v5e
topology: v5e:2x2
jax: 0.10.0
libtpu: 0.0.40
codegen_flags: <defaults>
</compile_context>

<pallas_src>
import jax
import jax.numpy as jnp
from jax.experimental import pallas as pl
from jax.experimental.pallas import tpu as pltpu


def fused_conv_add_cat_kernel(x_ref, w_ref, b_ref, other_ref, out_ref):
    # x_ref:     (Cin,  M)    channel-major activations
    # w_ref:     (Cout, Cin)  1x1 conv weight (squeezed)
    # b_ref:     (Cout, 1)    bias, broadcast along lanes
    # other_ref: (Cout, M)
    # out_ref:   (3*Cout, M)  fused concat output (all three slices)
    cout = other_ref.shape[0]
    other = other_ref[...]
    acc = jnp.dot(w_ref[...], x_ref[...], preferred_element_type=jnp.float32)
    # slice 0: conv + bias + other
    out_ref[0:cout, :] = (acc + b_ref[...] + other).astype(out_ref.dtype)
    # slices 1 and 2: copies of `other` (the fused torch.cat)
    out_ref[cout:2 * cout, :] = other.astype(out_ref.dtype)
    out_ref[2 * cout:3 * cout, :] = other.astype(out_ref.dtype)


def fused_conv_add_cat(x_cm, w_t, b, other_cm):
    """x_cm: (Cin, M), w_t: (Cout, Cin), b: (Cout, 1), other_cm: (Cout, M).

    Returns (3*Cout, M): rows [0:Cout] = conv+bias+other, rows [Cout:2*Cout]
    and [2*Cout:3*Cout] = other (fused torch.cat along dim 0)."""
    Cin, M = x_cm.shape
    Cout = w_t.shape[0]

    flops = 2 * Cout * Cin * M
    bytes_accessed = 4 * (Cin * M + Cout * Cin + Cout + Cout * M + 3 * Cout * M)

    return pl.pallas_call(
        fused_conv_add_cat_kernel,
        out_shape=jax.ShapeDtypeStruct((3 * Cout, M), x_cm.dtype),
        grid=(1,),  # single step: no pipeline bookkeeping, one output DMA pass
        in_specs=[
            # Full-array blocks (equal to array dims -> no (8,128) issue),
            # fetched exactly once.
            pl.BlockSpec((Cin, M), lambda i: (0, 0)),      # x
            pl.BlockSpec((Cout, Cin), lambda i: (0, 0)),   # weight
            pl.BlockSpec((Cout, 1), lambda i: (0, 0)),     # bias
            pl.BlockSpec((Cout, M), lambda i: (0, 0)),     # other
        ],
        # Lane-dense output: last dim M is a multiple of 128; 3*Cout = 24 rows
        # written in 8-row (sublane-aligned) static slices -> unmasked vst.
        out_specs=pl.BlockSpec((3 * Cout, M), lambda i: (0, 0)),
        compiler_params=pltpu.CompilerParams(
            # Do not shard this us-scale workload across TCs.
            dimension_semantics=("arbitrary",),
        ),
        cost_estimate=pl.CostEstimate(
            flops=flops, transcendentals=0, bytes_accessed=bytes_accessed),
    )(x_cm, w_t, b, other_cm)


@jax.jit
def model_forward(x1, other, w_oihw, bias):
    """Replicates:
        v1 = Conv2d(20, 8, 1)(x1)            # NCHW
        v2 = v1 + other
        v3 = torch.cat([v2, other, other])   # along dim 0
    """
    N, Cin, H, W = x1.shape
    Cout = w_oihw.shape[0]
    M = N * H * W

    # NCHW -> (Cin, N*H*W).  For N == 1 these transposes are degenerate
    # (size-1 axis) and fold into free reshapes.
    x_cm = jnp.transpose(x1, (1, 0, 2, 3)).reshape(Cin, M)
    other_cm = jnp.transpose(other, (1, 0, 2, 3)).reshape(Cout, M)

    w_t = w_oihw[:, :, 0, 0]        # (Cout, Cin)
    b = bias.reshape(Cout, 1)       # lane-broadcast inside the kernel

    out_flat = fused_conv_add_cat(x_cm, w_t, b, other_cm)   # (3*Cout, M)

    # (3*Cout, N*H*W) -> (3*N, Cout, H, W); batch transpose is a no-op for N==1.
    v3 = jnp.transpose(out_flat.reshape(3, Cout, N, H, W),
                       (0, 2, 1, 3, 4)).reshape(3 * N, Cout, H, W)
    return v3


if __name__ == "__main__":
    key = jax.random.PRNGKey(0)
    k_x, k_o, k_w, k_b = jax.random.split(key, 4)

    N, Cin, Cout, H, W = 1, 20, 8, 16, 16

    x1 = jax.random.normal(k_x, (N, Cin, H, W), dtype=jnp.float32)
    # `other` must be a tensor of the conv-output shape for torch.cat to be
    # well-defined (the original script's scalar `other=1` would fail in cat).
    # TODO(synk): confirm intended `other` semantics; scalar other makes the
    # original torch.cat ill-defined.
    other = jax.random.normal(k_o, (N, Cout, H, W), dtype=jnp.float32)

    # Deterministic parameter init (kaiming-uniform-like bounds for 1x1 conv).
    fan_in = Cin
    bound = (1.0 / fan_in) ** 0.5
    w_oihw = jax.random.uniform(
        k_w, (Cout, Cin, 1, 1), minval=-bound, maxval=bound, dtype=jnp.float32)
    bias = jax.random.uniform(
        k_b, (Cout,), minval=-bound, maxval=bound, dtype=jnp.float32)

    out = model_forward(x1, other, w_oihw, bias)
    jax.block_until_ready(out)

    # Sanity check against a pure-JAX reference.
    v1_ref = jax.lax.conv_general_dilated(
        x1, w_oihw, window_strides=(1, 1), padding="VALID",
        dimension_numbers=("NCHW", "OIHW", "NCHW")) + bias.reshape(1, Cout, 1, 1)
    v3_ref = jnp.concatenate([v1_ref + other, other, other], axis=0)
    assert out.shape == (3 * N, Cout, H, W)
    assert jnp.allclose(out, v3_ref, atol=1e-5, rtol=1e-5)

    print("KERNEL_OK")
</pallas_src>

<mosaic_0001>
module attributes {stable_mosaic.version = 11 : i64} {
  func.func @fused_conv_add_cat_kernel(%arg0: i32, %arg1: memref<20x256xf32, #tpu.memory_space<vmem>>, %arg2: memref<8x20xf32, #tpu.memory_space<vmem>>, %arg3: memref<8x1xf32, #tpu.memory_space<vmem>>, %arg4: memref<8x256xf32, #tpu.memory_space<vmem>>, %arg5: memref<24x256xf32, #tpu.memory_space<vmem>>) attributes {dimension_semantics = [#tpu.dimension_semantics<arbitrary>], iteration_bounds = array<i64: 1>, scalar_prefetch = 0 : i64, scratch_operands = 0 : i64, tpu.core_type = #tpu.core_type<tc>, window_params = [{pipeline_mode = #tpu.pipeline_mode<synchronous>, transform_indices = @transform_0, window_bounds = array<i64: 20, 256>}, {pipeline_mode = #tpu.pipeline_mode<synchronous>, transform_indices = @transform_1, window_bounds = array<i64: 8, 20>}, {pipeline_mode = #tpu.pipeline_mode<synchronous>, transform_indices = @transform_2, window_bounds = array<i64: 8, 1>}, {pipeline_mode = #tpu.pipeline_mode<synchronous>, transform_indices = @transform_3, window_bounds = array<i64: 8, 256>}, {pipeline_mode = #tpu.pipeline_mode<synchronous>, transform_indices = @transform_4, window_bounds = array<i64: 24, 256>}]} {
    %c0 = arith.constant 0 : index
    %c0_0 = arith.constant 0 : index
    %0 = vector.load %arg4[%c0, %c0_0] : memref<8x256xf32, #tpu.memory_space<vmem>>, vector<8x256xf32>
    %c0_1 = arith.constant 0 : index
    %c0_2 = arith.constant 0 : index
    %1 = vector.load %arg2[%c0_1, %c0_2] : memref<8x20xf32, #tpu.memory_space<vmem>>, vector<8x20xf32>
    %c0_3 = arith.constant 0 : index
    %c0_4 = arith.constant 0 : index
    %2 = vector.load %arg1[%c0_3, %c0_4] : memref<20x256xf32, #tpu.memory_space<vmem>>, vector<20x256xf32>
    %cst = arith.constant dense<0.000000e+00> : vector<8x256xf32>
    %3 = tpu.matmul %1, %2, %cst {dimension_numbers = #tpu.dot_dimension_numbers<[1], [0], [0], [1], [0, 0, 1, 1], [], []>} : vector<8x20xf32>, vector<20x256xf32>, vector<8x256xf32> -> vector<8x256xf32>
    %c0_5 = arith.constant 0 : index
    %c0_6 = arith.constant 0 : index
    %4 = vector.load %arg3[%c0_5, %c0_6] : memref<8x1xf32, #tpu.memory_space<vmem>>, vector<8x1xf32>
    %5 = vector.broadcast %4 : vector<8x1xf32> to vector<8x256xf32>
    %6 = arith.addf %3, %5 : vector<8x256xf32>
    %7 = arith.addf %6, %0 : vector<8x256xf32>
    %c0_7 = arith.constant 0 : index
    %c0_8 = arith.constant 0 : index
    %8 = vector.load %arg5[%c0_7, %c0_8] : memref<24x256xf32, #tpu.memory_space<vmem>>, vector<8x256xf32>
    tpu.vector_store %arg5[%c0_7, %c0_8], %7 {strides = array<i32>} : memref<24x256xf32, #tpu.memory_space<vmem>>, vector<8x256xf32>,
    %c8 = arith.constant 8 : index
    %c0_9 = arith.constant 0 : index
    %9 = vector.load %arg5[%c8, %c0_9] : memref<24x256xf32, #tpu.memory_space<vmem>>, vector<8x256xf32>
    tpu.vector_store %arg5[%c8, %c0_9], %0 {strides = array<i32>} : memref<24x256xf32, #tpu.memory_space<vmem>>, vector<8x256xf32>,
    %c16 = arith.constant 16 : index
    %c0_10 = arith.constant 0 : index
    %10 = vector.load %arg5[%c16, %c0_10] : memref<24x256xf32, #tpu.memory_space<vmem>>, vector<8x256xf32>
    tpu.vector_store %arg5[%c16, %c0_10], %0 {strides = array<i32>} : memref<24x256xf32, #tpu.memory_space<vmem>>, vector<8x256xf32>,
    return
  }
  func.func @transform_0(%arg0: i32) -> (i32, i32) {
    %c0_i32 = arith.constant 0 : i32
    %c0_i32_0 = arith.constant 0 : i32
    %c0_i32_1 = arith.constant 0 : i32
    return %c0_i32, %c0_i32_0 : i32, i32
  }
  func.func @transform_1(%arg0: i32) -> (i32, i32) {
    %c0_i32 = arith.constant 0 : i32
    %c0_i32_0 = arith.constant 0 : i32
    %c0_i32_1 = arith.constant 0 : i32
    return %c0_i32, %c0_i32_0 : i32, i32
  }
  func.func @transform_2(%arg0: i32) -> (i32, i32) {
    %c0_i32 = arith.constant 0 : i32
    %c0_i32_0 = arith.constant 0 : i32
    %c0_i32_1 = arith.constant 0 : i32
    return %c0_i32, %c0_i32_0 : i32, i32
  }
  func.func @transform_3(%arg0: i32) -> (i32, i32) {
    %c0_i32 = arith.constant 0 : i32
    %c0_i32_0 = arith.constant 0 : i32
    %c0_i32_1 = arith.constant 0 : i32
    return %c0_i32, %c0_i32_0 : i32, i32
  }
  func.func @transform_4(%arg0: i32) -> (i32, i32) {
    %c0_i32 = arith.constant 0 : i32
    %c0_i32_0 = arith.constant 0 : i32
    %c0_i32_1 = arith.constant 0 : i32
    return %c0_i32, %c0_i32_0 : i32, i32
  }
}

</mosaic_0001>

<bundles_post_ra>
// kernel: model_forward.1
= control target key start
LH: loop header
LB: loop body
LE: loop exit
PB: predicated region body
PF: predicated region fallthrough
CT: control target
= control target key end

     0   :  { %vm36_vm0 = vcmask 1043456   ;;  %v101_v3 = vmov 0   ;;  %vm32_vm1 = vcmask 162816   ;;  %s175_s0 = inlined_call_operand.vmem [shape: f32[20,256], index: 0, kind: input, shape index: {}]   ;;  %s176_s2 = inlined_call_operand.vmem [shape: f32[8,1], index: 2, kind: input, shape index: {}]   ;;  %s177_s1 = inlined_call_operand.vmem [shape: f32[8,20], index: 1, kind: input, shape index: {}]   ;;  %s178_s3 = inlined_call_operand.vmem [shape: f32[8,256], index: 3, kind: input, shape index: {}]   ;;  %s179_s4 = inlined_call_operand.vmem [shape: f32[24,256], index: 4, kind: output, shape index: {}]  }
   0x1   :  { %v24_v0 = vld [vmem:[%s175_s0 + $0x20] sm:$0xf]  ;;  %v25_v1 = vld [vmem:[%s175_s0 + $0x28] sm:$0xf]  ;;  %v22_v2 = vld [vmem:[%s175_s0 + $0x10] sm:$0xff]  ;;  %100 = vset.pattern.permute.xlu0 %v101_v3 }
   0x2   :  { %95 = vmatpush.msk.msra.mxu0 %vm36_vm0, %v24_v0  ;;  %97 = vmatpush.msk.msra.mxu1 %vm36_vm0, %v25_v1  ;;  %v23_v4 = vld [vmem:[%s175_s0 + $0x18] sm:$0xff]  ;;  %v20_v5 = vld [vmem:[%s175_s0] sm:$0xff]  ;;  %v21_v6 = vld [vmem:[%s175_s0 + $0x8] sm:$0xff] }
   0x3   :  { %v26_v7 = vld [vmem:[%s176_s2] sm:$0xff]  ;;  %v18_v10 = vld [vmem:[%s178_s3 + $0x8] sm:$0xff] }
   0x4   :  { %57 = vmatpush.msra.mxu0 %v22_v2  ;;  %77 = vmatpush.msra.mxu1 %v23_v4  ;;  %v19_v8 = vld [vmem:[%s177_s1] sm:$0xff]  ;;  %88 = vst [vmem:[%s179_s4 + $0x18] sm:$0xff] %v18_v10 }
   0x5   :  { %29 = vperm.xlu0 %100, %v26_v7   ;;  %v17_v9 = vld [vmem:[%s178_s3] sm:$0xff]  ;;  %90 = vst [vmem:[%s179_s4 + $0x28] sm:$0xff] %v18_v10 }
   0x6   :  { %58 = vmatpush.msra.mxu0 %v20_v5  ;;  %78 = vmatpush.msra.mxu1 %v21_v6  ;;  %87 = vst [vmem:[%s179_s4 + $0x10] sm:$0xff] %v17_v9 }
   0x7   :  { %96 = vmatmul.msk.f32.vlgmr.msra.gmra.mxu0 %vm32_vm1, %v19_v8  ;;  %98 = vmatmul.msk.f32.vlgmr.msra.gmra.mxu1 %vm32_vm1, %v19_v8  ;;  %89 = vst [vmem:[%s179_s4 + $0x20] sm:$0xff] %v17_v9 }
  0x77   :  { %v30_v11 = vpop.permute.xlu0 %29 }
  0x84   :  { %v60_v12 = vpop.f32.mrf.mxu0  ;;  %v80_v13 = vpop.f32.mrf.mxu1 }
  0x85   :  { %v61_v14 = vadd.f32 %v60_v12, %v30_v11  ;;  %v81_v15 = vadd.f32 %v80_v13, %v30_v11 }
  0x87   :  { %v83_v16 = vadd.f32 %v61_v14, %v17_v9  ;;  %v84_v17 = vadd.f32 %v81_v15, %v18_v10 }
  0x89   :  { %85 = vst [vmem:[%s179_s4] sm:$0xff] %v83_v16 }
  0x8a   :  { %86 = vst [vmem:[%s179_s4 + $0x8] sm:$0xff] %v84_v17 }

</bundles_post_ra>
